<compile_context>
chip_gen: v5e
topology: v5e:2x2
jax: 0.10.0
libtpu: 0.0.40
codegen_flags: <defaults>
</compile_context>

<pallas_src>
import functools

import jax
import jax.numpy as jnp
from jax.experimental import pallas as pl
from jax.experimental.pallas import tpu as pltpu

HP = 128                 # lane-padded hidden / output width (vreg lane count)
BIAS_LANE = HP - 1       # padded lane that carries the constant "1" for b2/b3
SAT = 32.0               # tanh(32) == 1.0 in f32 -> drives BIAS_LANE of h1/h2 to 1

W1_ROW = 0               # rows   0..7  : w1 (replicated across the 8 sublanes)
B1_ROW = 8               # rows   8..15 : b1 (lane BIAS_LANE = SAT), replicated
W2_ROW = 16              # rows  16..143: w2 (HP x HP); row BIAS_LANE holds b2
W3_ROW = W2_ROW + HP     # rows 144..271: w3 (HP x HP); row BIAS_LANE holds b3
SLAB_ROWS = W3_ROW + HP  # 272 rows x 128 lanes x 4 B ~= 136 KiB VMEM

MAX_TM = 1024            # rows per grid block cap (~2.5 MB block VMEM; limit is 16+ MiB)
MIN_SPLIT_TM = 128       # only split into >=2 blocks if each block gets >= this many rows


def _cdiv(a, b):
    return -(-a // b)


def _round8(x):
    return _cdiv(x, 8) * 8


# ----------------------------------------------------------------------------- kernel

def uwbnet_kernel(t_ref, slab_ref, out_ref, *, mxu_bf16):
    t = t_ref[...]                                 # (TM, 1) f32
    w1 = slab_ref[W1_ROW:W1_ROW + 1, :]            # (1, HP); tile is sublane-replicated
    b1 = slab_ref[B1_ROW:B1_ROW + 1, :]            # (1, HP); lane BIAS_LANE = SAT
    w2 = slab_ref[W2_ROW:W2_ROW + HP, :]           # (HP, HP); row BIAS_LANE = b2
    w3 = slab_ref[W3_ROW:W3_ROW + HP, :]           # (HP, HP); row BIAS_LANE = b3

    # Layer 1: Linear(1 -> H) + tanh.  Contraction dim is 1 -> pure VPU broadcast
    # multiply + EUP tanh, no MXU.  Padded lanes stay exactly 0 except BIAS_LANE,
    # which saturates to 1.0 (b1[BIAS_LANE] = SAT) and feeds b2 through the MXU.
    h1 = jnp.tanh(t * w1 + b1)                     # (TM, HP) f32

    if mxu_bf16:
        # bf16 only at the MXU boundary (f32 accumulation, f32 tanh / layer 1).
        h1 = h1.astype(jnp.bfloat16)
        w2 = w2.astype(jnp.bfloat16)
    # Layer 2: Linear(H -> H) + tanh; b2 folded into w2's bias row, and
    # w2[BIAS_LANE, BIAS_LANE] = SAT re-saturates the bias lane of h2 to 1.0.
    h2 = jnp.tanh(jnp.dot(h1, w2, preferred_element_type=jnp.float32))

    if mxu_bf16:
        h2 = h2.astype(jnp.bfloat16)
        w3 = w3.astype(jnp.bfloat16)
    # Layer 3: Linear(H -> out_dim); b3 folded into w3's bias row.
    # Lane-dense (TM, 128) store; padded output lanes are exact zeros.
    # (A bf16 out dtype would halve the HBM writeback if callers tolerate it.)
    out_ref[...] = jnp.dot(h2, w3, preferred_element_type=jnp.float32)


# --------------------------------------------------- single-buffered-slab capability probe

_SINGLE_BUFFER_SUPPORTED = None


def _probe_kernel(x_ref, o_ref):
    o_ref[...] = x_ref[...] * 2.0


def _single_buffer_supported():
    """One-time probe: does this JAX build accept pipeline_mode=pl.Buffered(1) on a
    constant-index BlockSpec in a TPU pallas_call?  If yes, the resident weight slab
    is single-buffered (no dead second buffer, no per-step re-DMA risk); otherwise
    we silently fall back to the default double-buffered spec."""
    global _SINGLE_BUFFER_SUPPORTED
    if _SINGLE_BUFFER_SUPPORTED is None:
        try:
            spec = pl.BlockSpec((8, HP), lambda i: (0, 0),
                                pipeline_mode=pl.Buffered(1))
            out = pl.pallas_call(
                _probe_kernel,
                out_shape=jax.ShapeDtypeStruct((16, HP), jnp.float32),
                grid=(2,),
                in_specs=[spec],
                out_specs=pl.BlockSpec((8, HP), lambda i: (i, 0)),
            )(jnp.ones((8, HP), jnp.float32))
            jax.block_until_ready(out)
            _SINGLE_BUFFER_SUPPORTED = True
        except Exception:  # version-dependent feature: fall back, never fail
            _SINGLE_BUFFER_SUPPORTED = False
    return _SINGLE_BUFFER_SUPPORTED


# ----------------------------------------------------------------------------- wrappers

def _choose_block_rows(m):
    """Rows-per-block TM: as large as possible (fewer grid steps = less per-step
    pipeline overhead), but keep the grid length EVEN once each block has at least
    MIN_SPLIT_TM rows so both v7x TensorCores engage under 'parallel' semantics."""
    m8 = max(8, _round8(m))
    if m8 < 2 * MIN_SPLIT_TM:
        return m8                                   # single block, overhead-minimal
    n_blocks = max(2, 2 * _cdiv(m8, 2 * MAX_TM))    # even block count, each <= ~MAX_TM
    return _round8(_cdiv(m8, n_blocks))


@functools.partial(jax.jit, static_argnames=("tm", "mxu_bf16", "single_buffer"))
def _uwbnet_apply(t_batch, slab, *, tm, mxu_bf16, single_buffer):
    m = t_batch.shape[0]
    m_pad = _cdiv(m, tm) * tm
    t2d = jnp.pad(t_batch.astype(jnp.float32).reshape(m, 1),
                  ((0, m_pad - m), (0, 0)))

    if single_buffer:
        slab_spec = pl.BlockSpec((SLAB_ROWS, HP), lambda i: (0, 0),
                                 pipeline_mode=pl.Buffered(1))
    else:
        slab_spec = pl.BlockSpec((SLAB_ROWS, HP), lambda i: (0, 0))

    out = pl.pallas_call(
        functools.partial(uwbnet_kernel, mxu_bf16=mxu_bf16),
        out_shape=jax.ShapeDtypeStruct((m_pad, HP), jnp.float32),
        grid_spec=pltpu.PrefetchScalarGridSpec(
            num_scalar_prefetch=0,
            grid=(m_pad // tm,),
            in_specs=[
                pl.BlockSpec((tm, 1), lambda i: (i, 0)),   # t rows
                slab_spec,                                 # weights, resident
            ],
            out_specs=pl.BlockSpec((tm, HP), lambda i: (i, 0)),
        ),
        compiler_params=pltpu.CompilerParams(
            dimension_semantics=("parallel",)),
    )(t2d, slab)
    return out[:m]


def uwbnet_apply_batched(t_batch, slab, *, mxu_bf16=False):
    """Evaluate the MLP for M independent t values in one pallas_call.

    t_batch: (M,) f32  ->  (M, HP) f32 lane-padded output (real cols = out_dim).
    Prefer this over per-timestep uwbnet_forward calls: the single-t path is
    almost entirely launch + pipeline-prologue overhead.
    """
    tm = _choose_block_rows(t_batch.shape[0])
    return _uwbnet_apply(t_batch, slab, tm=tm, mxu_bf16=mxu_bf16,
                         single_buffer=_single_buffer_supported())


def uwbnet_forward(t, slab, *, io_dim, width):
    """Faithful port of UWBNet.forward: t has shape (1,); returns (u, w, b)."""
    bs = io_dim * width
    uwb = uwbnet_apply_batched(jnp.reshape(t, (-1,)), slab)[0]   # (HP,)
    u = uwb[:bs].reshape(width, 1, io_dim)
    w = uwb[bs:2 * bs].reshape(width, io_dim, 1)
    b = uwb[2 * bs:2 * bs + width].reshape(width, 1, 1)
    return u, w, b


# ------------------------------------------------------------------- params & packing

def init_uwbnet_params(key, io_dim, hidden_dim=64, width=1):
    """nn.Linear-style U(-1/sqrt(fan_in), 1/sqrt(fan_in)); weights stored (in, out)."""
    out_dim = 2 * io_dim * width + width
    ks = jax.random.split(key, 6)

    def lin(kw, kb, fan_in, fan_out):
        bound = 1.0 / (fan_in ** 0.5)
        w = jax.random.uniform(kw, (fan_in, fan_out), jnp.float32, -bound, bound)
        b = jax.random.uniform(kb, (1, fan_out), jnp.float32, -bound, bound)
        return w, b

    w1, b1 = lin(ks[0], ks[1], 1, hidden_dim)
    w2, b2 = lin(ks[2], ks[3], hidden_dim, hidden_dim)
    w3, b3 = lin(ks[4], ks[5], hidden_dim, out_dim)
    return dict(w1=w1, b1=b1, w2=w2, b2=b2, w3=w3, b3=b3)


def pack_uwbnet_params(params, hidden_dim, out_dim):
    """Pack the six params into one zero-padded (272, 128) f32 slab (host-side, once).

    Layout: w1/b1 replicated across all 8 sublanes of their tiles; b2/b3 folded into
    row BIAS_LANE of the w2/w3 blocks; b1[BIAS_LANE] = w2[BIAS_LANE, BIAS_LANE] = SAT
    so tanh saturates the bias lane of h1/h2 to exactly 1.0 (hidden_dim < 128 keeps
    that lane free of real data).
    """
    assert hidden_dim < HP, "bias-lane fold assumes hidden_dim < 128"
    assert out_dim <= HP, "packed layout assumes out_dim <= 128"
    h, o = hidden_dim, out_dim

    w1_row = jnp.zeros((HP,), jnp.float32).at[:h].set(params["w1"][0])
    b1_row = (jnp.zeros((HP,), jnp.float32)
              .at[:h].set(params["b1"][0])
              .at[BIAS_LANE].set(SAT))

    slab = jnp.zeros((SLAB_ROWS, HP), jnp.float32)
    slab = slab.at[W1_ROW:W1_ROW + 8, :].set(jnp.tile(w1_row[None, :], (8, 1)))
    slab = slab.at[B1_ROW:B1_ROW + 8, :].set(jnp.tile(b1_row[None, :], (8, 1)))
    slab = slab.at[W2_ROW:W2_ROW + h, :h].set(params["w2"])
    slab = slab.at[W2_ROW + BIAS_LANE, :h].set(params["b2"][0])
    slab = slab.at[W2_ROW + BIAS_LANE, BIAS_LANE].set(SAT)
    slab = slab.at[W3_ROW:W3_ROW + h, :o].set(params["w3"])
    slab = slab.at[W3_ROW + BIAS_LANE, :o].set(params["b3"][0])
    return slab


# ----------------------------------------------------------------------------- reference

def uwbnet_reference(t, params, io_dim, width):
    """Pure-JAX reference of the PyTorch forward pass."""
    bs = io_dim * width
    x = jnp.reshape(t, (-1, 1)).astype(jnp.float32)
    h1 = jnp.tanh(x @ params["w1"] + params["b1"])
    h2 = jnp.tanh(h1 @ params["w2"] + params["b2"])
    uwb = (h2 @ params["w3"] + params["b3"])[0]
    u = uwb[:bs].reshape(width, 1, io_dim)
    w = uwb[bs:2 * bs].reshape(width, io_dim, 1)
    b = uwb[-width:].reshape(width, 1, 1)
    return u, w, b


def uwbnet_reference_batched(t_batch, params):
    x = t_batch.reshape(-1, 1).astype(jnp.float32)
    h1 = jnp.tanh(x @ params["w1"] + params["b1"])
    h2 = jnp.tanh(h1 @ params["w2"] + params["b2"])
    return h2 @ params["w3"] + params["b3"]


if __name__ == "__main__":
    io_dim, hidden_dim, width = 8, 32, 2
    out_dim = 2 * io_dim * width + width               # 34

    key = jax.random.PRNGKey(0)
    k_params, k_t, k_tb = jax.random.split(key, 3)
    params = init_uwbnet_params(k_params, io_dim, hidden_dim=hidden_dim, width=width)
    slab = pack_uwbnet_params(params, hidden_dim, out_dim)

    # --- module-faithful single-t forward (M = 1, padded to 8 rows) ----------
    t = jax.random.uniform(k_t, (1,), jnp.float32)
    u, w, b = jax.block_until_ready(
        uwbnet_forward(t, slab, io_dim=io_dim, width=width))
    u_ref, w_ref, b_ref = uwbnet_reference(t, params, io_dim, width)
    assert u.shape == (width, 1, io_dim)
    assert w.shape == (width, io_dim, 1)
    assert b.shape == (width, 1, 1)
    assert jnp.allclose(u, u_ref, atol=1e-5)
    assert jnp.allclose(w, w_ref, atol=1e-5)
    assert jnp.allclose(b, b_ref, atol=1e-5)

    # --- batched path: 200 timesteps (single large block, f32 exact) ---------
    tb = jax.random.uniform(k_tb, (200,), jnp.float32)
    out_b = jax.block_until_ready(uwbnet_apply_batched(tb, slab))[:, :out_dim]
    ref_b = uwbnet_reference_batched(tb, params)
    assert out_b.shape == (200, out_dim)
    assert jnp.allclose(out_b, ref_b, atol=1e-5)

    # --- batched path: 300 timesteps -> even 2-block grid ("parallel" axis) --
    tb2 = jax.random.uniform(k_tb, (300,), jnp.float32)
    out_b2 = jax.block_until_ready(uwbnet_apply_batched(tb2, slab))[:, :out_dim]
    ref_b2 = uwbnet_reference_batched(tb2, params)
    assert out_b2.shape == (300, out_dim)
    assert jnp.allclose(out_b2, ref_b2, atol=1e-5)

    # --- optional bf16-at-the-MXU-boundary mode (loose tolerance by design) --
    out_bf = jax.block_until_ready(
        uwbnet_apply_batched(tb, slab, mxu_bf16=True))[:, :out_dim]
    assert jnp.allclose(out_bf, ref_b, atol=2e-1)

    print("KERNEL_OK")
</pallas_src>

<mosaic_0001>
module attributes {stable_mosaic.version = 11 : i64} {
  func.func @_probe_kernel(%arg0: i32, %arg1: memref<8x128xf32, #tpu.memory_space<vmem>>, %arg2: memref<8x128xf32, #tpu.memory_space<vmem>>) attributes {dimension_semantics = [#tpu.dimension_semantics<arbitrary>], iteration_bounds = array<i64: 2>, scalar_prefetch = 0 : i64, scratch_operands = 0 : i64, tpu.core_type = #tpu.core_type<tc>, window_params = [{pipeline_mode = #tpu.pipeline_mode<synchronous>, transform_indices = @transform_0, window_bounds = array<i64: 8, 128>}, {transform_indices = @transform_1, window_bounds = array<i64: 8, 128>}]} {
    %c0 = arith.constant 0 : index
    %c0_0 = arith.constant 0 : index
    %0 = vector.load %arg1[%c0, %c0_0] : memref<8x128xf32, #tpu.memory_space<vmem>>, vector<8x128xf32>
    %cst = arith.constant 2.000000e+00 : f32
    %1 = vector.broadcast %cst : f32 to vector<8x128xf32>
    %2 = arith.mulf %0, %1 : vector<8x128xf32>
    %c0_1 = arith.constant 0 : index
    %c0_2 = arith.constant 0 : index
    %3 = vector.load %arg2[%c0_1, %c0_2] : memref<8x128xf32, #tpu.memory_space<vmem>>, vector<8x128xf32>
    tpu.vector_store %arg2[%c0_1, %c0_2], %2 {strides = array<i32>} : memref<8x128xf32, #tpu.memory_space<vmem>>, vector<8x128xf32>,
    return
  }
  func.func @transform_0(%arg0: i32) -> (i32, i32) {
    %c0_i32 = arith.constant 0 : i32
    %c0_i32_0 = arith.constant 0 : i32
    %c0_i32_1 = arith.constant 0 : i32
    return %c0_i32, %c0_i32_0 : i32, i32
  }
  func.func @transform_1(%arg0: i32) -> (i32, i32) {
    %c0_i32 = arith.constant 0 : i32
    %c0_i32_0 = arith.constant 0 : i32
    return %arg0, %c0_i32 : i32, i32
  }
}

module attributes {stable_mosaic.version = 11 : i64} {
  func.func @uwbnet_kernel(%arg0: i32, %arg1: memref<8x1xf32, #tpu.memory_space<vmem>>, %arg2: memref<272x128xf32, #tpu.memory_space<vmem>>, %arg3: memref<8x128xf32, #tpu.memory_space<vmem>>) attributes {dimension_semantics = [#tpu.dimension_semantics<parallel>], iteration_bounds = array<i64: 1>, scalar_prefetch = 0 : i64, scratch_operands = 0 : i64, tpu.core_type = #tpu.core_type<tc>, window_params = [{transform_indices = @transform_0, window_bounds = array<i64: 8, 1>}, {pipeline_mode = #tpu.pipeline_mode<synchronous>, transform_indices = @transform_1, window_bounds = array<i64: 272, 128>}, {transform_indices = @transform_2, window_bounds = array<i64: 8, 128>}]} {
    %c0 = arith.constant 0 : index
    %c0_0 = arith.constant 0 : index
    %0 = vector.load %arg1[%c0, %c0_0] : memref<8x1xf32, #tpu.memory_space<vmem>>, vector<8x1xf32>
    %c0_1 = arith.constant 0 : index
    %c0_2 = arith.constant 0 : index
    %1 = vector.load %arg2[%c0_1, %c0_2] : memref<272x128xf32, #tpu.memory_space<vmem>>, vector<1x128xf32>
    %c8 = arith.constant 8 : index
    %c0_3 = arith.constant 0 : index
    %2 = vector.load %arg2[%c8, %c0_3] : memref<272x128xf32, #tpu.memory_space<vmem>>, vector<1x128xf32>
    %c16 = arith.constant 16 : index
    %c0_4 = arith.constant 0 : index
    %3 = vector.load %arg2[%c16, %c0_4] : memref<272x128xf32, #tpu.memory_space<vmem>>, vector<128x128xf32>
    %c144 = arith.constant 144 : index
    %c0_5 = arith.constant 0 : index
    %4 = vector.load %arg2[%c144, %c0_5] : memref<272x128xf32, #tpu.memory_space<vmem>>, vector<128x128xf32>
    %5 = vector.broadcast %0 : vector<8x1xf32> to vector<8x128xf32>
    %6 = vector.broadcast %1 : vector<1x128xf32> to vector<8x128xf32>
    %7 = arith.mulf %5, %6 : vector<8x128xf32>
    %8 = vector.broadcast %2 : vector<1x128xf32> to vector<8x128xf32>
    %9 = arith.addf %7, %8 : vector<8x128xf32>
    %10 = math.tanh %9 : vector<8x128xf32>
    %cst = arith.constant dense<0.000000e+00> : vector<8x128xf32>
    %11 = tpu.matmul %10, %3, %cst {dimension_numbers = #tpu.dot_dimension_numbers<[1], [0], [0], [1], [0, 0, 1, 1], [], []>} : vector<8x128xf32>, vector<128x128xf32>, vector<8x128xf32> -> vector<8x128xf32>
    %12 = math.tanh %11 : vector<8x128xf32>
    %cst_6 = arith.constant dense<0.000000e+00> : vector<8x128xf32>
    %13 = tpu.matmul %12, %4, %cst_6 {dimension_numbers = #tpu.dot_dimension_numbers<[1], [0], [0], [1], [0, 0, 1, 1], [], []>} : vector<8x128xf32>, vector<128x128xf32>, vector<8x128xf32> -> vector<8x128xf32>
    %c0_7 = arith.constant 0 : index
    %c0_8 = arith.constant 0 : index
    %14 = vector.load %arg3[%c0_7, %c0_8] : memref<8x128xf32, #tpu.memory_space<vmem>>, vector<8x128xf32>
    tpu.vector_store %arg3[%c0_7, %c0_8], %13 {strides = array<i32>} : memref<8x128xf32, #tpu.memory_space<vmem>>, vector<8x128xf32>,
    return
  }
  func.func @transform_0(%arg0: i32) -> (i32, i32) {
    %c0_i32 = arith.constant 0 : i32
    %c0_i32_0 = arith.constant 0 : i32
    return %arg0, %c0_i32 : i32, i32
  }
  func.func @transform_1(%arg0: i32) -> (i32, i32) {
    %c0_i32 = arith.constant 0 : i32
    %c0_i32_0 = arith.constant 0 : i32
    %c0_i32_1 = arith.constant 0 : i32
    return %c0_i32, %c0_i32_0 : i32, i32
  }
  func.func @transform_2(%arg0: i32) -> (i32, i32) {
    %c0_i32 = arith.constant 0 : i32
    %c0_i32_0 = arith.constant 0 : i32
    return %arg0, %c0_i32 : i32, i32
  }
}

</mosaic_0001>

<bundles_post_ra>
// kernel: tpu_custom_call.1
= control target key start
LH: loop header
LB: loop body
LE: loop exit
PB: predicated region body
PF: predicated region fallthrough
CT: control target
= control target key end

     0   :  { %6 = vsyncpa [#allocation3], 0  ;;  %s441_s0 = inlined_call_operand.hbm [shape: f32[8,128], index: 0, kind: input, shape index: {}]   ;;  %s442_s1 = inlined_call_operand.hbm [shape: f32[16,128], index: 1, kind: output, shape index: {}]  }
   0x1   :  { %7 = vsyncpa [#allocation4], 0 }
   0x2   :  { %9 = vsyncpa [#allocation4 + $0x1], 0  ;;  %s357_s6 = smov 0   ;;  %s359_s7 = smov 0  }
   0x3   :  { %s361_s8 = smov 0   ;;  %s363_s9 = smov 0  }
   0x4 LB: > { %s378_s10 = sadd.s32 4294967295, %s344_s9   ;;  %s188_s11 = sadd.s32 4294967294, %s344_s9   ;;  %s344_s9 = sphi %s363_s9, %s448_s9   ;;  %s340_s8 = sphi %s361_s8, %s447_s8   ;;  %s336_s7 = sphi %s359_s7, %s446_s7   ;;  %s332_s6 = sphi %s357_s6, %s445_s6  }
   0x5   : > { %s382_s12 = sadd.s32 1, %s344_s9   ;;  %s43_s13 = sadd.s32 1, %s340_s8 }
   0x6   : > { %s40_s14 = ssub.s32 %s344_s9, %s382_s12  ;;  %p53_p0 = scmp.ne.s32.totalorder %s340_s8, %s336_s7 }
   0x7   : > { %p41_p1 = scmp.eq.s32.totalorder %s40_s14, 0  ;;  %p54_p2 = scmp.eq.s32.totalorder %s378_s10, 1 }
   0x8   : > { %p59_p3 = scmp.ne.s32.totalorder %s336_s7, %s332_s6  ;;  %p60_p4 = scmp.eq.s32.totalorder %s188_s11, 1 }
   0x9   : > { %s393_s15 = scalar_select %p41_p1, %s340_s8, %s43_s13  }
   0xa   : > { %p395_p5 = por %p54_p2, %p53_p0  ;;  %p399_p6 = por %p60_p4, %p59_p3 }
   0xb   : > { %p189_p7 = scmp.ge.s32.totalorder %s344_s9, 1  ;;  %p67_p8 = scmp.lt.s32.totalorder %s344_s9, 3 }
   0xc   : > { %p212_p9 = scmp.eq.s32.totalorder %s378_s10, 0  ;;  %s79_s20 = sshll.u32 %s441_s0, 4  ;;  %s80_s20 = int_to_ptr.hbm [resolvable:$true] %s79_s20 }
   0xd   : > { %p68_p10 = pnand %p189_p7, %p67_p8  ;;  %s346_s21 = smov [#allocation2]  }
   0xe   : > { %s81_s22 = sshll.u32 %s346_s21, 4  ;;  %s82_s22 = int_to_ptr.vmem [resolvable:$true] %s81_s22 }
   0xf   : > { %p204_p11 = pneg %p68_p10  ;;  %94 = sbr.rel (%p68_p10) target bundleno = 37 (0x25), region = 24 }
  0x11   : > { %p205_p12 = pnand %p212_p9, %p204_p11 }
  0x13   : > { %207 = dma.hbm_to_vmem [thread:$0]  (!%p205_p12), %s80_s20, 128, %s82_s22, [#allocation3]  }
  0x14   : > { %323 = dma.done.wait (%p212_p9), [#allocation3], 128  }
  0x15   : > { %325 = vsyncadd (%p212_p9), [#allocation3], 4294967168  ;;  %s107_s23 = sand.u32 1, %s336_s7   ;;  %s195_s24 = sshll.u32 %s378_s10, 3  ;;  %v110_v0 = vld [vmem:[#allocation2] sm:$0xff] }
  0x16   : > { %s193_s25 = sshll.u32 %s107_s23, 3  ;;  %s124_s28 = scalar_lea.hbm %s442_s1, %s195_s24  ;;  %v111_v1 = vmul.f32 2.0, %v110_v0 }
  0x17   : > { %s109_s29 = scalar_lea.vmem [#allocation5], %s193_s25  ;;  %s128_s2 = sshll.u32 %s124_s28, 4  ;;  %s129_s2 = int_to_ptr.hbm [resolvable:$true] %s128_s2 }
  0x18   : > { %s126_s30 = sshll.u32 %s109_s29, 4  ;;  %112 = vst [vmem:[%s109_s29] sm:$0xff] %v111_v1  ;;  %s114_s3 = scalar_lea.sflag [#allocation4], %s107_s23  ;;  %s127_s30 = int_to_ptr.vmem [resolvable:$true] %s126_s30 }
  0x19   : > { %s292_s4 = sshra.s32 %s129_s2, 4  ;;  %s298_s13 = scalar_lea.hbm %s442_s1, 16  ;;  %s293_s4 = int_to_ptr.hbm [resolvable:$true] %s292_s4 }
  0x1a   : > { %s294_s5 = scalar_lea.hbm %s293_s4, 8  ;;  %p299_p2 = scmp.lt.s32.totalorder %s293_s4, %s442_s1 }
  0x1b   : > { %p295_p13 = scmp.ne.s32.totalorder %s293_s4, %s294_s5  ;;  %p300_p3 = scmp.lt.s32.totalorder %s298_s13, %s294_s5 }
  0x1d   : > { %p296_p0 = pnand %p295_p13, %p395_p5  ;;  %p301_p4 = por %p300_p3, %p299_p2 }
  0x1f   : > { %p297_p1 = pneg %p296_p0 }
  0x21   : > { %p302_p7 = pnand %p301_p4, %p297_p1 }
  0x23   : > { %305 = shalt.err (!%p302_p7)
}
  0x24   : > { %202 = dma.vmem_to_hbm [thread:$0]  (%p395_p5), %s127_s30, 128, %s129_s2, %s114_s3  }
  0x25 PF: > { %p214_p8 = scmp.ge.s32.totalorder %s344_s9, 2  ;;  %s140_s19 = sand.u32 1, %s332_s6  }
  0x26   : > { %s141_s20 = scalar_lea.sflag [#allocation4], %s140_s19 }
  0x27   : > { %p209_p9 = pnand %p214_p8, %p399_p6 }
  0x29   : > { %p210_p10 = pneg %p209_p9 }
  0x2b   : > { %327 = dma.done.wait (%p210_p10), %s141_s20, 128  }
  0x2c   : > { %329 = vsyncadd (%p210_p10), %s141_s20, 4294967168  ;;  %p12_p11 = scmp.ge.s32.totalorder %s382_s12, 4   ;;  %s445_s6 = smov %s336_s7 }
  0x2d   : > { %s446_s7 = smov %s340_s8  ;;  %s447_s8 = smov %s393_s15 }
  0x2e   : > { %s448_s9 = smov %s382_s12  ;;  %14 = sbr.rel (!%p12_p11) target bundleno = 4 (0x4), region = 61 }
  0x33   :  { %147 = vsyncpa [#allocation3], 1 }
  0x34   :  { %149 = vsyncpa [#allocation3 + $0x1], 1 }
  0x35   :  { %150 = vsyncpa [#allocation4], 1 }
  0x36   :  { %152 = vsyncpa [#allocation4 + $0x1], 1 }

// kernel: _uwbnet_apply.1
= control target key start
LH: loop header
LB: loop body
LE: loop exit
PB: predicated region body
PF: predicated region fallthrough
CT: control target
= control target key end

     0   :  { %7 = vsyncpa [#allocation3], 0  ;;  %s156_s12 = smov [#allocation2]   ;;  %s157_s14 = smov 128   ;;  %s184_s0 = inlined_call_operand.vmem [shape: f32[8,1], index: 0, kind: input, shape index: {}]   ;;  %s185_s1 = inlined_call_operand.hbm [shape: f32[272,128], index: 1, kind: input, shape index: {}]   ;;  %s186_s2 = inlined_call_operand.vmem [shape: f32[8,128], index: 2, kind: output, shape index: {}]  }
   0x1   :  { %s14_s11 = sshll.u32 %s185_s1, 4  ;;  %s16_s13 = sshll.u32 %s156_s12, 4  ;;  %s15_s11 = int_to_ptr.hbm [resolvable:$true] %s14_s11  ;;  %s17_s13 = int_to_ptr.vmem [resolvable:$true] %s16_s13 }
   0x2   :  { %s158_s15 = smov 8  }
   0x3   :  { %22 = dma.hbm_to_vmem [thread:$0]  %s15_s11, 4352, %s17_s13, [#allocation3], %s157_s14, %s157_s14, %s158_s15  }
   0x4   :  { %154 = dma.done.wait [#allocation3], 4352  }
   0x5   :  { %155 = vsyncadd [#allocation3], 4294962944  ;;  %v159_v0 = vmov 0   ;;  %v27_v1 = vld [vmem:[%s184_s0] sm:$0xff]  ;;  %v45_v2 = vld [vmem:[#allocation2 + $0x88] sm:$0xff] }
   0x6   :  { %123 = vset.pattern.permute.xlu0 %v159_v0  ;;  %v44_v3 = vld [vmem:[#allocation2 + $0x80] sm:$0xff]  ;;  %72 = vmatpush.msra.mxu0 %v45_v2  ;;  %v43_v4 = vld [vmem:[#allocation2 + $0x78] sm:$0xff]  ;;  %v42_v5 = vld [vmem:[#allocation2 + $0x70] sm:$0xff] }
   0x7   :  { %64 = vperm.xlu0 %123, %v27_v1   ;;  %v41_v6 = vld [vmem:[#allocation2 + $0x68] sm:$0xff]  ;;  %v40_v7 = vld [vmem:[#allocation2 + $0x60] sm:$0xff]  ;;  %v39_v8 = vld [vmem:[#allocation2 + $0x58] sm:$0xff] }
   0x8   :  { %73 = vmatpush.msra.mxu0 %v44_v3  ;;  %v38_v9 = vld [vmem:[#allocation2 + $0x50] sm:$0xff]  ;;  %v37_v10 = vld [vmem:[#allocation2 + $0x48] sm:$0xff]  ;;  %v36_v11 = vld [vmem:[#allocation2 + $0x40] sm:$0xff] }
   0x9   :  { %v35_v12 = vld [vmem:[#allocation2 + $0x38] sm:$0xff]  ;;  %v34_v13 = vld [vmem:[#allocation2 + $0x30] sm:$0xff]  ;;  %v33_v14 = vld [vmem:[#allocation2 + $0x28] sm:$0xff] }
   0xa   :  { %74 = vmatpush.msra.mxu0 %v43_v4  ;;  %v32_v15 = vld [vmem:[#allocation2 + $0x20] sm:$0xff]  ;;  %v31_v16 = vld [vmem:[#allocation2 + $0x18] sm:$0xff]  ;;  %v30_v17 = vld [vmem:[#allocation2 + $0x10] sm:$0xff] }
   0xb   :  { %v61_v18 = vld [vmem:[#allocation2 + $0x108] sm:$0xff]  ;;  %v60_v19 = vld [vmem:[#allocation2 + $0x100] sm:$0xff]  ;;  %v59_v20 = vld [vmem:[#allocation2 + $0xf8] sm:$0xff] }
   0xc   :  { %75 = vmatpush.msra.mxu0 %v42_v5  ;;  %93 = vmatpush.msra.mxu1 %v61_v18  ;;  %v58_v21 = vld [vmem:[#allocation2 + $0xf0] sm:$0xff]  ;;  %v57_v22 = vld [vmem:[#allocation2 + $0xe8] sm:$0xff]  ;;  %v56_v23 = vld [vmem:[#allocation2 + $0xe0] sm:$0xff] }
   0xd   :  { %v55_v24 = vld [vmem:[#allocation2 + $0xd8] sm:$0xff]  ;;  %v54_v25 = vld [vmem:[#allocation2 + $0xd0] sm:$0xff]  ;;  %v53_v26 = vld [vmem:[#allocation2 + $0xc8] sm:$0xff] }
   0xe   :  { %76 = vmatpush.msra.mxu0 %v41_v6  ;;  %94 = vmatpush.msra.mxu1 %v60_v19  ;;  %v52_v27 = vld [vmem:[#allocation2 + $0xc0] sm:$0xff]  ;;  %v51_v29 = vld [vmem:[#allocation2 + $0xb8] sm:$0xff]  ;;  %v125_v30 = vld [vmem:[#allocation2 + $0x8] ss:$0 sm:$0xff] }
   0xf   :  { %v124_v28 = vld [vmem:[#allocation2] ss:$0 sm:$0xff]  ;;  %v50_v32 = vld [vmem:[#allocation2 + $0xb0] sm:$0xff]  ;;  %v49_v36 = vld [vmem:[#allocation2 + $0xa8] sm:$0xff] }
  0x10   :  { %77 = vmatpush.msra.mxu0 %v40_v7  ;;  %95 = vmatpush.msra.mxu1 %v59_v20  ;;  %v48_v37 = vld [vmem:[#allocation2 + $0xa0] sm:$0xff]  ;;  %v47_v38 = vld [vmem:[#allocation2 + $0x98] sm:$0xff]  ;;  %v46_v39 = vld [vmem:[#allocation2 + $0x90] sm:$0xff] }
  0x12   :  { %78 = vmatpush.msra.mxu0 %v39_v8  ;;  %96 = vmatpush.msra.mxu1 %v58_v21 }
  0x14   :  { %79 = vmatpush.msra.mxu0 %v38_v9  ;;  %97 = vmatpush.msra.mxu1 %v57_v22 }
  0x16   :  { %80 = vmatpush.msra.mxu0 %v37_v10  ;;  %98 = vmatpush.msra.mxu1 %v56_v23 }
  0x18   :  { %81 = vmatpush.msra.mxu0 %v36_v11  ;;  %99 = vmatpush.msra.mxu1 %v55_v24 }
  0x1a   :  { %82 = vmatpush.msra.mxu0 %v35_v12  ;;  %100 = vmatpush.msra.mxu1 %v54_v25 }
  0x1c   :  { %83 = vmatpush.msra.mxu0 %v34_v13  ;;  %101 = vmatpush.msra.mxu1 %v53_v26 }
  0x1e   :  { %84 = vmatpush.msra.mxu0 %v33_v14  ;;  %102 = vmatpush.msra.mxu1 %v52_v27 }
  0x20   :  { %85 = vmatpush.msra.mxu0 %v32_v15  ;;  %103 = vmatpush.msra.mxu1 %v51_v29 }
  0x22   :  { %86 = vmatpush.msra.mxu0 %v31_v16  ;;  %104 = vmatpush.msra.mxu1 %v50_v32 }
  0x24   :  { %87 = vmatpush.msra.mxu0 %v30_v17  ;;  %105 = vmatpush.msra.mxu1 %v49_v36 }
  0x26   :  { %106 = vmatpush.msra.mxu1 %v48_v37 }
  0x28   :  { %107 = vmatpush.msra.mxu1 %v47_v38 }
  0x2a   :  { %108 = vmatpush.msra.mxu1 %v46_v39 }
  0x79   :  { %v65_v31 = vpop.permute.xlu0 %64 }
  0x7a   :  { %v68_v33 = vmul.f32 %v124_v28, %v65_v31 }
  0x7c   :  { %v70_v34 = vadd.f32 %v125_v30, %v68_v33 }
  0x7e   :  { %126 = vtanh.f32 %v70_v34 }
  0x84   :  { %v127_v35 = vpop.eup %126 }
  0x85   :  { %88 = vmatmul.f32.vlgmr.msra.gmra.mxu0 %v127_v35 }
 0x102   :  { %v89_v40 = vpop.f32.mrf.mxu0 }
 0x103   :  { %128 = vtanh.f32 %v89_v40 }
 0x109   :  { %v129_v41 = vpop.eup %128 }
 0x10a   :  { %109 = vmatmul.f32.vlgmr.msra.gmra.mxu1 %v129_v41 }
 0x187   :  { %v110_v42 = vpop.f32.mrf.mxu1 }
 0x188   :  { %113 = vst [vmem:[%s186_s2] sm:$0xff] %v110_v42 }
 0x189   :  { %118 = vsyncpa [#allocation3], 1 }

</bundles_post_ra>
